<compile_context>
chip_gen: v6e
topology: v6e:2x2x1
jax: 0.10.0
libtpu: 0.0.40
codegen_flags: <defaults>
</compile_context>

<pallas_src>
import math

import jax
import jax.numpy as jnp
from jax.experimental import pallas as pl
from jax.experimental.pallas import tpu as pltpu

_VMEM_LIMIT = 32 * 1024 * 1024  # safe scoped-VMEM limit on v5e/v6e/v7x; tiles fit easily


def _round_up(x, m):
    return (x + m - 1) // m * m


def _tile_rows(M, tile_m):
    tm = min(tile_m, _round_up(M, 8))
    return tm, _round_up(M, tm)


def _pad_rows(x, Mp):
    M = x.shape[0]
    return x if Mp == M else jnp.pad(x, ((0, Mp - M), (0, 0)))


# ----------------------------- Pallas kernels ------------------------------

def _q_posadd_kernel(x_ref, p_ref, w_ref, b_ref, o_ref):
    # q = (x + pos_q) @ (Wq*scale) + bq*scale  (scale pre-folded into the weights)
    x = (x_ref[...] + p_ref[...]).astype(jnp.bfloat16)
    y = jnp.dot(x, w_ref[...], preferred_element_type=jnp.float32) + b_ref[...]
    o_ref[...] = y.astype(o_ref.dtype)


def _kv_fused_kernel(x_ref, w_ref, bias_ref, o_ref):
    # [k | v] = xr @ [Wk | Wv] + [pos_k@Wk + bk | bv]   (single 2C-wide MXU op)
    y = jnp.dot(x_ref[...], w_ref[...], preferred_element_type=jnp.float32) + bias_ref[...]
    o_ref[...] = y.astype(o_ref.dtype)


def _sr_ln_kernel(x_ref, w_ref, b_ref, g_ref, bt_ref, o_ref):
    # SR conv (as patch matmul) + LayerNorm epilogue, no HBM round trip
    y = jnp.dot(x_ref[...], w_ref[...], preferred_element_type=jnp.float32) + b_ref[...]
    mu = jnp.mean(y, axis=-1, keepdims=True)
    var = jnp.mean((y - mu) ** 2, axis=-1, keepdims=True)
    o_ref[...] = ((y - mu) * jax.lax.rsqrt(var + 1e-5) * g_ref[...]
                  + bt_ref[...]).astype(o_ref.dtype)


def _attn_proj_kernel(q_ref, k_ref, v_ref, wp_ref, bp_ref, o_ref):
    # q: (H, TQ, d)  k/v: (H, Nk, d)  all bf16, head-major -> heads are a batch dim
    q = q_ref[0]
    k = k_ref[0]
    v = v_ref[0]
    # scores: batched over heads, contraction on head_dim (no explicit transpose)
    s = jax.lax.dot_general(q, k, (((2,), (2,)), ((0,), (0,))),
                            preferred_element_type=jnp.float32)      # (H, TQ, Nk)
    s = s - jnp.max(s, axis=-1, keepdims=True)
    e = jnp.exp(s)
    p = (e * pl.reciprocal(jnp.sum(e, axis=-1, keepdims=True),
                           approx=True)).astype(jnp.bfloat16)
    o = jax.lax.dot_general(p, v, (((2,), (1,)), ((0,), (0,))),
                            preferred_element_type=jnp.float32)      # (H, TQ, d)
    # fused output projection: per-head partial proj then sum over heads
    oc = jax.lax.dot_general(o.astype(jnp.bfloat16), wp_ref[...],
                             (((2,), (1,)), ((0,), (0,))),
                             preferred_element_type=jnp.float32)     # (H, TQ, C)
    # single lane-dense (TQ, C) store
    o_ref[0] = jnp.sum(oc, axis=0) + bp_ref[...]


# ------------------------------ Pallas wrappers -----------------------------

def _row_compiler_params():
    return pltpu.CompilerParams(dimension_semantics=("parallel",),
                                vmem_limit_bytes=_VMEM_LIMIT)


def q_proj_pallas(x, pos, w_bf16, b, tile_m=512):
    M, K = x.shape
    Kout = w_bf16.shape[1]
    tm, Mp = _tile_rows(M, tile_m)
    xp, pp = _pad_rows(x, Mp), _pad_rows(pos, Mp)
    out = pl.pallas_call(
        _q_posadd_kernel,
        out_shape=jax.ShapeDtypeStruct((Mp, Kout), jnp.bfloat16),
        grid=(Mp // tm,),
        in_specs=[
            pl.BlockSpec((tm, K), lambda i: (i, 0)),
            pl.BlockSpec((tm, K), lambda i: (i, 0)),
            pl.BlockSpec((K, Kout), lambda i: (0, 0)),
            pl.BlockSpec((1, Kout), lambda i: (0, 0)),
        ],
        out_specs=pl.BlockSpec((tm, Kout), lambda i: (i, 0)),
        compiler_params=_row_compiler_params(),
    )(xp, pp, w_bf16, b.reshape(1, Kout))
    return out[:M]


def kv_fused_pallas(xr_bf16, wkv_bf16, bias, tile_m=512):
    M, K = xr_bf16.shape
    Kout = wkv_bf16.shape[1]
    tm, Mp = _tile_rows(M, tile_m)
    xp, bp = _pad_rows(xr_bf16, Mp), _pad_rows(bias, Mp)
    out = pl.pallas_call(
        _kv_fused_kernel,
        out_shape=jax.ShapeDtypeStruct((Mp, Kout), jnp.bfloat16),
        grid=(Mp // tm,),
        in_specs=[
            pl.BlockSpec((tm, K), lambda i: (i, 0)),
            pl.BlockSpec((K, Kout), lambda i: (0, 0)),
            pl.BlockSpec((tm, Kout), lambda i: (i, 0)),
        ],
        out_specs=pl.BlockSpec((tm, Kout), lambda i: (i, 0)),
        compiler_params=_row_compiler_params(),
    )(xp, wkv_bf16, bp)
    return out[:M]


def sr_ln_pallas(patches_bf16, w_bf16, b, gamma, beta, tile_m=512):
    M, K = patches_bf16.shape
    Kout = w_bf16.shape[1]
    tm, Mp = _tile_rows(M, tile_m)
    xp = _pad_rows(patches_bf16, Mp)
    out = pl.pallas_call(
        _sr_ln_kernel,
        out_shape=jax.ShapeDtypeStruct((Mp, Kout), jnp.bfloat16),
        grid=(Mp // tm,),
        in_specs=[
            pl.BlockSpec((tm, K), lambda i: (i, 0)),
            pl.BlockSpec((K, Kout), lambda i: (0, 0)),
            pl.BlockSpec((1, Kout), lambda i: (0, 0)),
            pl.BlockSpec((1, Kout), lambda i: (0, 0)),
            pl.BlockSpec((1, Kout), lambda i: (0, 0)),
        ],
        out_specs=pl.BlockSpec((tm, Kout), lambda i: (i, 0)),
        compiler_params=_row_compiler_params(),
    )(xp, w_bf16, b.reshape(1, Kout), gamma.reshape(1, Kout), beta.reshape(1, Kout))
    return out[:M]


def attention_proj_pallas(q_hm, k_hm, v_hm, wp_r_bf16, bp, tile_q=256):
    """q_hm: (B, H, N, d) bf16; k_hm/v_hm: (B, H, Nk, d) bf16; returns (B, N, C) fp32
    with the output projection fused into the epilogue."""
    B, H, N, d = q_hm.shape
    Nk = k_hm.shape[2]
    C = H * d
    tq, Np_ = _tile_rows(N, tile_q)
    qp = q_hm if Np_ == N else jnp.pad(q_hm, ((0, 0), (0, 0), (0, Np_ - N), (0, 0)))
    out = pl.pallas_call(
        _attn_proj_kernel,
        out_shape=jax.ShapeDtypeStruct((B, Np_, C), jnp.float32),
        grid=(B, Np_ // tq),
        in_specs=[
            pl.BlockSpec((1, H, tq, d), lambda b, i: (b, 0, i, 0)),
            pl.BlockSpec((1, H, Nk, d), lambda b, i: (b, 0, 0, 0)),
            pl.BlockSpec((1, H, Nk, d), lambda b, i: (b, 0, 0, 0)),
            pl.BlockSpec((H, d, C), lambda b, i: (0, 0, 0)),
            pl.BlockSpec((1, C), lambda b, i: (0, 0)),
        ],
        out_specs=pl.BlockSpec((1, tq, C), lambda b, i: (b, i, 0)),
        compiler_params=pltpu.CompilerParams(
            dimension_semantics=("parallel", "parallel"),
            vmem_limit_bytes=_VMEM_LIMIT),
    )(qp, k_hm, v_hm, wp_r_bf16, bp.reshape(1, C))
    return out[:, :N]


# -------------------------- plain-JAX reference ops -------------------------
# (PyTorch op order; bf16 MXU operands, fp32 accumulation, exact softmax)

def linear_ref(x, w_bf16, b):
    return jnp.dot(x.astype(jnp.bfloat16), w_bf16,
                   preferred_element_type=jnp.float32) + b[None, :]


def layernorm_ref(x, gamma, beta):
    mu = jnp.mean(x, axis=-1, keepdims=True)
    var = jnp.mean((x - mu) ** 2, axis=-1, keepdims=True)
    return (x - mu) * jax.lax.rsqrt(var + 1e-5) * gamma[None, :] + beta[None, :]


def attention_ref(q, k, v, scale, num_heads):
    B, N, C = q.shape
    Nk = k.shape[1]
    d = C // num_heads
    qh = q.reshape(B, N, num_heads, d).transpose(0, 2, 1, 3).astype(jnp.bfloat16)
    kh = k.reshape(B, Nk, num_heads, d).transpose(0, 2, 1, 3).astype(jnp.bfloat16)
    vh = v.reshape(B, Nk, num_heads, d).transpose(0, 2, 1, 3).astype(jnp.bfloat16)
    s = jnp.einsum("bhnd,bhkd->bhnk", qh, kh,
                   preferred_element_type=jnp.float32) * scale
    p = jax.nn.softmax(s, axis=-1)
    o = jnp.einsum("bhnk,bhkd->bhnd", p.astype(jnp.bfloat16), vh,
                   preferred_element_type=jnp.float32)
    return o.transpose(0, 2, 1, 3).reshape(B, N, C)


# --------------------------------- glue -------------------------------------

def coords_grid(B, H, W):
    # matches RAFT coords_grid: channel 0 = x (column), channel 1 = y (row)
    ys, xs = jnp.meshgrid(jnp.arange(H, dtype=jnp.float32),
                          jnp.arange(W, dtype=jnp.float32), indexing="ij")
    coords = jnp.stack([xs, ys], axis=0)                      # (2, H, W)
    return jnp.broadcast_to(coords[None], (B, 2, H, W))


def linear_position_embedding_sine(coords, dim):
    # coords: (B, N, 2) -> (B, N, dim); matches FlowFormer LinearPositionEmbeddingSine
    # NOTE: 3.14 (not math.pi) is intentional FlowFormer fidelity.
    freq = jnp.linspace(0.0, dim // 4 - 1, dim // 4, dtype=jnp.float32)
    fac = 1.0 / 200.0
    a = 3.14 * coords[..., 0:1] * freq * fac
    b = 3.14 * coords[..., 1:2] * freq * fac
    return jnp.concatenate([jnp.sin(a), jnp.cos(a), jnp.sin(b), jnp.cos(b)], axis=-1)


def init_params(key, dim, sr_ratio):
    keys = jax.random.split(key, 10)

    def lin(kw, kb, fan_in, fan_out):
        bound = 1.0 / math.sqrt(fan_in)
        w = jax.random.uniform(kw, (fan_in, fan_out), jnp.float32, -bound, bound)
        b = jax.random.uniform(kb, (fan_out,), jnp.float32, -bound, bound)
        return w, b

    p = {}
    p["q_w"], p["q_b"] = lin(keys[0], keys[1], dim, dim)
    p["k_w"], p["k_b"] = lin(keys[2], keys[3], dim, dim)
    p["v_w"], p["v_b"] = lin(keys[4], keys[5], dim, dim)
    p["proj_w"], p["proj_b"] = lin(keys[6], keys[7], dim, dim)
    if sr_ratio > 1:
        fan_in = dim * sr_ratio * sr_ratio
        bound = 1.0 / math.sqrt(fan_in)
        # Conv2d weight convention (Cout, Cin, kh, kw), flattened to (kh*kw*Cin, Cout)
        # in (di, dj, ci) patch order to match the HWC patch-flatten below.
        w_conv = jax.random.uniform(keys[8], (dim, dim, sr_ratio, sr_ratio),
                                    jnp.float32, -bound, bound)
        p["sr_w"] = jnp.transpose(w_conv, (2, 3, 1, 0)).reshape(
            sr_ratio * sr_ratio * dim, dim)
        p["sr_b"] = jax.random.uniform(keys[9], (dim,), jnp.float32, -bound, bound)
        p["ln_g"] = jnp.ones((dim,), jnp.float32)
        p["ln_b"] = jnp.zeros((dim,), jnp.float32)
    return p


def cross_gsa_rpe_forward(params, x, tgt, size, num_heads, sr_ratio, use_pallas=True):
    B, N, C = x.shape
    H, W = size
    assert H * W == N and C % num_heads == 0 and C % 4 == 0
    head_dim = C // num_heads
    scale = head_dim ** (-0.5)

    # query-side sine RPE at full resolution
    coords_q = coords_grid(B, H, W).reshape(B, 2, N).transpose(0, 2, 1)
    pos_q = linear_position_embedding_sine(coords_q, C).reshape(B * N, C)

    if sr_ratio > 1:
        Hs, Ws = H // sr_ratio, W // sr_ratio
        Nk = Hs * Ws
    else:
        Hs, Ws, Nk = H, W, N

    # key-side sine RPE at reduced resolution (scaled back by sr_ratio)
    coords_k = coords_grid(B, Hs, Ws).reshape(B, 2, Nk).transpose(0, 2, 1) * float(sr_ratio)
    pos_k = linear_position_embedding_sine(coords_k, C).reshape(B * Nk, C)

    kw = params["k_w"].astype(jnp.bfloat16)
    vw = params["v_w"].astype(jnp.bfloat16)

    if use_pallas:
        # softmax scale folded into the q projection (one-time weight transform)
        qw_s = (params["q_w"] * scale).astype(jnp.bfloat16)
        qb_s = params["q_b"] * scale

        # spatial reduction of tgt (Conv2d k=s=sr as bf16 patch-flatten + matmul) + LN
        # TODO(synk): the patch-flatten transpose still goes through XLA/HBM (in bf16);
        # a fully fused strided-read SR kernel would remove that round trip entirely.
        if sr_ratio > 1:
            srw = params["sr_w"].astype(jnp.bfloat16)
            tgt_grid = tgt.astype(jnp.bfloat16).reshape(B, H, W, C)[
                :, :Hs * sr_ratio, :Ws * sr_ratio, :]
            patches = tgt_grid.reshape(B, Hs, sr_ratio, Ws, sr_ratio, C)
            patches = jnp.transpose(patches, (0, 1, 3, 2, 4, 5)).reshape(
                B * Nk, sr_ratio * sr_ratio * C)
            xr = sr_ln_pallas(patches, srw, params["sr_b"],
                              params["ln_g"], params["ln_b"])
        else:
            xr = tgt.reshape(B * N, C).astype(jnp.bfloat16)

        # q = (x + pos_q) @ (Wq*scale) + bq*scale   (bf16 activations out)
        q = q_proj_pallas(x.reshape(B * N, C), pos_q, qw_s, qb_s)

        # fused K/V: xr @ [Wk | Wv] + [pos_k@Wk + bk | bv]  (single 2C-wide matmul)
        wkv = jnp.concatenate([kw, vw], axis=1)
        bias_k = jnp.dot(pos_k.astype(jnp.bfloat16), kw,
                         preferred_element_type=jnp.float32) + params["k_b"][None, :]
        bias_v = jnp.broadcast_to(params["v_b"][None, :], (B * Nk, C))
        kv = kv_fused_pallas(xr, wkv, jnp.concatenate([bias_k, bias_v], axis=1))

        # head-major (B, heads, seq, head_dim) layout plumbing for the attention kernel
        q_hm = q.reshape(B, N, num_heads, head_dim).transpose(0, 2, 1, 3)
        k_hm = kv[:, :C].reshape(B, Nk, num_heads, head_dim).transpose(0, 2, 1, 3)
        v_hm = kv[:, C:].reshape(B, Nk, num_heads, head_dim).transpose(0, 2, 1, 3)

        # proj weight presented head-major (H, d, C) for the fused epilogue
        wp_r = params["proj_w"].reshape(num_heads, head_dim, C).astype(jnp.bfloat16)
        out = attention_proj_pallas(q_hm, k_hm, v_hm, wp_r, params["proj_b"])
    else:
        qw = params["q_w"].astype(jnp.bfloat16)
        pw = params["proj_w"].astype(jnp.bfloat16)
        if sr_ratio > 1:
            srw = params["sr_w"].astype(jnp.bfloat16)
            tgt_grid = tgt.reshape(B, H, W, C)[:, :Hs * sr_ratio, :Ws * sr_ratio, :]
            patches = tgt_grid.reshape(B, Hs, sr_ratio, Ws, sr_ratio, C)
            patches = jnp.transpose(patches, (0, 1, 3, 2, 4, 5)).reshape(
                B * Nk, sr_ratio * sr_ratio * C)
            xr = layernorm_ref(linear_ref(patches, srw, params["sr_b"]),
                               params["ln_g"], params["ln_b"])
        else:
            xr = tgt.reshape(B * N, C)
        q = linear_ref(x.reshape(B * N, C) + pos_q, qw, params["q_b"])
        k = linear_ref(xr + pos_k, kw, params["k_b"])
        v = linear_ref(xr, vw, params["v_b"])
        out = attention_ref(q.reshape(B, N, C), k.reshape(B, Nk, C),
                            v.reshape(B, Nk, C), scale, num_heads)
        out = linear_ref(out.reshape(B * N, C), pw, params["proj_b"])
    # attn_drop / proj_drop are 0.0 (eval semantics) -> identity
    return out.reshape(B, N, C)


# --------------------------------- main --------------------------------------

if __name__ == "__main__":
    B, H, W = 2, 8, 8
    dim, num_heads, sr_ratio = 32, 4, 2
    N = H * W

    key = jax.random.PRNGKey(0)
    kx, kt, kp = jax.random.split(key, 3)
    x = jax.random.normal(kx, (B, N, dim), jnp.float32)
    tgt = jax.random.normal(kt, (B, N, dim), jnp.float32)
    params = init_params(kp, dim, sr_ratio)

    out = cross_gsa_rpe_forward(params, x, tgt, (H, W), num_heads, sr_ratio,
                                use_pallas=True)
    out = jax.block_until_ready(out)

    ref = cross_gsa_rpe_forward(params, x, tgt, (H, W), num_heads, sr_ratio,
                                use_pallas=False)
    assert out.shape == (B, N, dim), out.shape
    max_err = float(jnp.max(jnp.abs(out - ref)))
    # bf16 MXU operands, approx softmax reciprocal, scale-folding and pos-bias
    # decomposition (exact in fp32, reordered in bf16) -> loosened tolerance
    assert max_err < 5e-2, f"mismatch vs reference: {max_err}"

    print("KERNEL_OK")
</pallas_src>

<mosaic_0001>
module attributes {stable_mosaic.version = 11 : i64} {
  func.func @_sr_ln_kernel(%arg0: i32, %arg1: memref<32x128xbf16, #tpu.memory_space<vmem>>, %arg2: memref<128x32xbf16, #tpu.memory_space<vmem>>, %arg3: memref<1x32xf32, #tpu.memory_space<vmem>>, %arg4: memref<1x32xf32, #tpu.memory_space<vmem>>, %arg5: memref<1x32xf32, #tpu.memory_space<vmem>>, %arg6: memref<32x32xbf16, #tpu.memory_space<vmem>>) attributes {dimension_semantics = [#tpu.dimension_semantics<parallel>], iteration_bounds = array<i64: 1>, scalar_prefetch = 0 : i64, scratch_operands = 0 : i64, tpu.core_type = #tpu.core_type<tc>, window_params = [{transform_indices = @transform_0, window_bounds = array<i64: 32, 128>}, {pipeline_mode = #tpu.pipeline_mode<synchronous>, transform_indices = @transform_1, window_bounds = array<i64: 128, 32>}, {pipeline_mode = #tpu.pipeline_mode<synchronous>, transform_indices = @transform_2, window_bounds = array<i64: 1, 32>}, {pipeline_mode = #tpu.pipeline_mode<synchronous>, transform_indices = @transform_3, window_bounds = array<i64: 1, 32>}, {pipeline_mode = #tpu.pipeline_mode<synchronous>, transform_indices = @transform_4, window_bounds = array<i64: 1, 32>}, {transform_indices = @transform_5, window_bounds = array<i64: 32, 32>}]} {
    %c0 = arith.constant 0 : index
    %c0_0 = arith.constant 0 : index
    %0 = vector.load %arg1[%c0, %c0_0] : memref<32x128xbf16, #tpu.memory_space<vmem>>, vector<32x128xbf16>
    %c0_1 = arith.constant 0 : index
    %c0_2 = arith.constant 0 : index
    %1 = vector.load %arg2[%c0_1, %c0_2] : memref<128x32xbf16, #tpu.memory_space<vmem>>, vector<128x32xbf16>
    %cst = arith.constant dense<0.000000e+00> : vector<32x32xf32>
    %2 = tpu.matmul %0, %1, %cst {dimension_numbers = #tpu.dot_dimension_numbers<[1], [0], [0], [1], [0, 0, 1, 1], [], []>} : vector<32x128xbf16>, vector<128x32xbf16>, vector<32x32xf32> -> vector<32x32xf32>
    %c0_3 = arith.constant 0 : index
    %c0_4 = arith.constant 0 : index
    %3 = vector.load %arg3[%c0_3, %c0_4] : memref<1x32xf32, #tpu.memory_space<vmem>>, vector<1x32xf32>
    %4 = vector.broadcast %3 : vector<1x32xf32> to vector<32x32xf32>
    %5 = arith.addf %2, %4 : vector<32x32xf32>
    %cst_5 = arith.constant dense<0.000000e+00> : vector<32xf32>
    %6 = vector.multi_reduction <add>, %5, %cst_5 [1] : vector<32x32xf32> to vector<32xf32>
    %7 = vector.shape_cast %6 : vector<32xf32> to vector<32x1xf32>
    %cst_6 = arith.constant 3.200000e+01 : f32
    %8 = vector.broadcast %cst_6 : f32 to vector<32x1xf32>
    %9 = arith.divf %7, %8 : vector<32x1xf32>
    %10 = vector.broadcast %9 : vector<32x1xf32> to vector<32x32xf32>
    %11 = arith.subf %5, %10 : vector<32x32xf32>
    %12 = arith.mulf %11, %11 : vector<32x32xf32>
    %cst_7 = arith.constant dense<0.000000e+00> : vector<32xf32>
    %13 = vector.multi_reduction <add>, %12, %cst_7 [1] : vector<32x32xf32> to vector<32xf32>
    %14 = vector.shape_cast %13 : vector<32xf32> to vector<32x1xf32>
    %cst_8 = arith.constant 3.200000e+01 : f32
    %15 = vector.broadcast %cst_8 : f32 to vector<32x1xf32>
    %16 = arith.divf %14, %15 : vector<32x1xf32>
    %17 = vector.broadcast %9 : vector<32x1xf32> to vector<32x32xf32>
    %18 = arith.subf %5, %17 : vector<32x32xf32>
    %cst_9 = arith.constant 9.99999974E-6 : f32
    %19 = vector.broadcast %cst_9 : f32 to vector<32x1xf32>
    %20 = arith.addf %16, %19 : vector<32x1xf32>
    %21 = math.rsqrt %20 : vector<32x1xf32>
    %22 = vector.broadcast %21 : vector<32x1xf32> to vector<32x32xf32>
    %23 = arith.mulf %18, %22 : vector<32x32xf32>
    %c0_10 = arith.constant 0 : index
    %c0_11 = arith.constant 0 : index
    %24 = vector.load %arg4[%c0_10, %c0_11] : memref<1x32xf32, #tpu.memory_space<vmem>>, vector<1x32xf32>
    %25 = vector.broadcast %24 : vector<1x32xf32> to vector<32x32xf32>
    %26 = arith.mulf %23, %25 : vector<32x32xf32>
    %c0_12 = arith.constant 0 : index
    %c0_13 = arith.constant 0 : index
    %27 = vector.load %arg5[%c0_12, %c0_13] : memref<1x32xf32, #tpu.memory_space<vmem>>, vector<1x32xf32>
    %28 = vector.broadcast %27 : vector<1x32xf32> to vector<32x32xf32>
    %29 = arith.addf %26, %28 : vector<32x32xf32>
    %30 = arith.truncf %29 : vector<32x32xf32> to vector<32x32xbf16>
    %c0_14 = arith.constant 0 : index
    %c0_15 = arith.constant 0 : index
    %31 = vector.load %arg6[%c0_14, %c0_15] : memref<32x32xbf16, #tpu.memory_space<vmem>>, vector<32x32xbf16>
    tpu.vector_store %arg6[%c0_14, %c0_15], %30 {strides = array<i32>} : memref<32x32xbf16, #tpu.memory_space<vmem>>, vector<32x32xbf16>,
    return
  }
  func.func @transform_0(%arg0: i32) -> (i32, i32) {
    %c0_i32 = arith.constant 0 : i32
    %c0_i32_0 = arith.constant 0 : i32
    return %arg0, %c0_i32 : i32, i32
  }
  func.func @transform_1(%arg0: i32) -> (i32, i32) {
    %c0_i32 = arith.constant 0 : i32
    %c0_i32_0 = arith.constant 0 : i32
    %c0_i32_1 = arith.constant 0 : i32
    return %c0_i32, %c0_i32_0 : i32, i32
  }
  func.func @transform_2(%arg0: i32) -> (i32, i32) {
    %c0_i32 = arith.constant 0 : i32
    %c0_i32_0 = arith.constant 0 : i32
    %c0_i32_1 = arith.constant 0 : i32
    return %c0_i32, %c0_i32_0 : i32, i32
  }
  func.func @transform_3(%arg0: i32) -> (i32, i32) {
    %c0_i32 = arith.constant 0 : i32
    %c0_i32_0 = arith.constant 0 : i32
    %c0_i32_1 = arith.constant 0 : i32
    return %c0_i32, %c0_i32_0 : i32, i32
  }
  func.func @transform_4(%arg0: i32) -> (i32, i32) {
    %c0_i32 = arith.constant 0 : i32
    %c0_i32_0 = arith.constant 0 : i32
    %c0_i32_1 = arith.constant 0 : i32
    return %c0_i32, %c0_i32_0 : i32, i32
  }
  func.func @transform_5(%arg0: i32) -> (i32, i32) {
    %c0_i32 = arith.constant 0 : i32
    %c0_i32_0 = arith.constant 0 : i32
    return %arg0, %c0_i32 : i32, i32
  }
}

</mosaic_0001>

<bundles_post_ra>
// kernel: tpu_custom_call.1
= control target key start
LH: loop header
LB: loop body
LE: loop exit
PB: predicated region body
PF: predicated region fallthrough
CT: control target
= control target key end

     0   :  { %s452_s0 = inlined_call_operand.vmem [shape: bf16[32,128], index: 0, kind: input, shape index: {}]   ;;  %s453_s1 = inlined_call_operand.vmem [shape: bf16[128,32], index: 1, kind: input, shape index: {}]   ;;  %s454_s2 = inlined_call_operand.vmem [shape: f32[1,32], index: 2, kind: input, shape index: {}]   ;;  %s455_s3 = inlined_call_operand.vmem [shape: f32[1,32], index: 3, kind: input, shape index: {}]   ;;  %s456_s4 = inlined_call_operand.vmem [shape: f32[1,32], index: 4, kind: input, shape index: {}]   ;;  %s457_s5 = inlined_call_operand.hbm [shape: bf16[32,32], index: 5, kind: output, shape index: {}]  }
   0x1   :  { %v325_v0 = vld [vmem:[%s453_s1 + $0x38] sm:$0xff]   ;;  %v326_v1 = vld [vmem:[%s453_s1 + $0x30] sm:$0xff]   ;;  %v327_v2 = vld [vmem:[%s453_s1 + $0x28] sm:$0xff]  }
   0x2   :  { %302 = vmatprep.subr.bf16.mxu0 %v325_v0  ;;  %v328_v3 = vld [vmem:[%s453_s1 + $0x20] sm:$0xff]  }
   0x3   :  { %303 = vmatpush3.bf16.msra.mxu0 %v325_v0  ;;  %v333_v4 = vld [vmem:[%s452_s0] sm:$0xff]  }
   0x4   :  { %304 = vmatprep.subr.bf16.mxu0 %v326_v1  ;;  %318 = vmatprep.mubr.bf16.mxu0 %v333_v4 }
   0x7   :  { %305 = vmatpush3.bf16.msra.mxu0 %v326_v1 }
   0x8   :  { %306 = vmatprep.subr.bf16.mxu0 %v327_v2 }
   0x9   :  { %10 = vsyncpa [#allocation3], 0  ;;  %v329_v5 = vld [vmem:[%s453_s1 + $0x18] sm:$0xff]   ;;  %v330_v6 = vld [vmem:[%s453_s1 + $0x10] sm:$0xff]   ;;  %vm158_vm0 = vcmask 261120   ;;  %vm250_vm1 = vcmask 257024  }
   0xa   :  { %v331_v7 = vld [vmem:[%s453_s1 + $0x8] sm:$0xff]   ;;  %v332_v8 = vld [vmem:[%s453_s1] sm:$0xff]  }
   0xb   :  { %307 = vmatpush3.bf16.msra.mxu0 %v327_v2  ;;  %v334_v9 = vld [vmem:[%s452_s0 + $0x8] sm:$0xff]   ;;  %v271_v10 = vld [vmem:[%s454_s2] ss:$0 sm:$0xff] }
   0xc   :  { %308 = vmatprep.subr.bf16.mxu0 %v328_v3  ;;  %v282_v56 = vld [vmem:[%s455_s3] ss:$0 sm:$0xff]  ;;  %s365_s3 = smov [#allocation2]  }
   0xd   :  { %v283_v58 = vld [vmem:[%s456_s4] ss:$0 sm:$0xff]  ;;  %s260_s4 = sshll.u32 %s365_s3, 4  ;;  %s261_s4 = int_to_ptr.vmem [resolvable:$true] %s260_s4 }
   0xe   :  { %s343_s16 = scalar_lea.vmem %s261_s4, 256  ;;  %p348_p1 = scmp.lt.s32.totalorder %s261_s4, %s261_s4 }
   0xf   :  { %309 = vmatpush3.bf16.msra.mxu0 %v328_v3  ;;  %p344_p0 = scmp.ne.s32.totalorder %s261_s4, %s343_s16  ;;  %p349_p2 = scmp.lt.s32.totalorder %s343_s16, %s343_s16 }
  0x10   :  { %310 = vmatprep.subr.bf16.mxu0 %v329_v5 }
  0x11   :  { %p350_p3 = por %p349_p2, %p348_p1 }
  0x13   :  { %311 = vmatpush3.bf16.msra.mxu0 %v329_v5  ;;  %p351_p4 = pnand %p350_p3, %p344_p0 }
  0x14   :  { %312 = vmatprep.subr.bf16.mxu0 %v330_v6 }
  0x17   :  { %313 = vmatpush3.bf16.msra.mxu0 %v330_v6 }
  0x18   :  { %314 = vmatprep.subr.bf16.mxu0 %v331_v7 }
  0x1b   :  { %315 = vmatpush3.bf16.msra.mxu0 %v331_v7 }
  0x1c   :  { %316 = vmatprep.subr.bf16.mxu0 %v332_v8 }
  0x1f   :  { %317 = vmatpush3.bf16.msra.mxu0 %v332_v8 }
  0x22   :  { %319 = vmatmul.mubr.bf16.vlgmr.msra.gmra.mxu0 %v334_v9 }
  0xe2   :  { %v320_v11 = vpop.f32.mrf.mxu0 }
  0xe3   :  { %v152_v12 = vadd.f32 %v320_v11, %v271_v10 }
  0xe4   :  { %v143_v13 = vpop.f32.mrf.mxu0 }
  0xe5   :  { %v144_v14 = vadd.f32 %v271_v10, %v143_v13  ;;  %v165_v15 = vsel %vm158_vm0, %v152_v12, 0.0 }
  0xe6   :  { %166 = vadd.xlane.f32.xlu1 %v165_v15  ;;  %v321_v16 = vpop.f32.mrf.mxu0 }
  0xe7   :  { %v155_v17 = vadd.f32 %v321_v16, %v271_v10  ;;  %v159_v18 = vsel %vm158_vm0, %v144_v14, 0.0 }
  0xe8   :  { %v146_v19 = vpop.f32.mrf.mxu0  ;;  %160 = vadd.xlane.f32.xlu0 %v159_v18 }
  0xe9   :  { %v147_v20 = vadd.f32 %v271_v10, %v146_v19  ;;  %v168_v21 = vsel %vm158_vm0, %v155_v17, 0.0 }
  0xea   :  { %169 = vadd.xlane.f32.xlu1 %v168_v21 }
  0xeb   :  { %v162_v22 = vsel %vm158_vm0, %v147_v20, 0.0 }
  0xec   :  { %163 = vadd.xlane.f32.xlu0 %v162_v22 }
 0x16f   :  { %v167_v23 = vpop.xlane.xlu1 %166 }
 0x170   :  { %v174_v24 = vmul.f32 0.03125, %v167_v23 }
 0x171   :  { %v161_v25 = vpop.xlane.xlu0 %160 }
 0x172   :  { %v172_v26 = vmul.f32 0.03125, %v161_v25  ;;  %v178_v28 = vsub.f32 %v152_v12, %v174_v24 }
 0x173   :  { %v170_v27 = vpop.xlane.xlu1 %169 }
 0x174   :  { %v176_v29 = vsub.f32 %v144_v14, %v172_v26  ;;  %v175_v30 = vmul.f32 0.03125, %v170_v27  ;;  %v182_v37 = vmul.f32 %v178_v28, %v178_v28 }
 0x175   :  { %v164_v31 = vpop.xlane.xlu0 %163 }
 0x176   :  { %v173_v32 = vmul.f32 0.03125, %v164_v31  ;;  %v180_v33 = vmul.f32 %v176_v29, %v176_v29  ;;  %v179_v34 = vsub.f32 %v155_v17, %v175_v30  ;;  %v190_v39 = vsel %vm158_vm0, %v182_v37, 0.0 }
 0x178   :  { %v177_v35 = vsub.f32 %v147_v20, %v173_v32  ;;  %v184_v36 = vsel %vm158_vm0, %v180_v33, 0.0  ;;  %v183_v41 = vmul.f32 %v179_v34, %v179_v34 }
 0x179   :  { %185 = vadd.xlane.f32.xlu0 %v184_v36 }
 0x17a   :  { %v181_v38 = vmul.f32 %v177_v35, %v177_v35  ;;  %v193_v42 = vsel %vm158_vm0, %v183_v41, 0.0 }
 0x17c   :  { %v187_v40 = vsel %vm158_vm0, %v181_v38, 0.0 }
 0x17d   :  { %191 = vadd.xlane.f32.xlu0 %v190_v39  ;;  %188 = vadd.xlane.f32.xlu1 %v187_v40 }
 0x181   :  { %194 = vadd.xlane.f32.xlu1 %v193_v42 }
 0x202   :  { %v186_v43 = vpop.xlane.xlu0 %185 }
 0x203   :  { %v196_v44 = vmul.f32 0.03125, %v186_v43 }
 0x205   :  { %v200_v45 = vadd.f32 1e-05, %v196_v44 }
 0x206   :  { %v189_v46 = vpop.xlane.xlu1 %188  ;;  %v192_v47 = vpop.xlane.xlu0 %191 }
 0x207   :  { %335 = vrsqrt.f32 %v200_v45  ;;  %v197_v48 = vmul.f32 0.03125, %v189_v46  ;;  %v198_v49 = vmul.f32 0.03125, %v192_v47 }
 0x209   :  { %v201_v50 = vadd.f32 1e-05, %v197_v48  ;;  %v202_v51 = vadd.f32 1e-05, %v198_v49 }
 0x20a   :  { %v195_v52 = vpop.xlane.xlu1 %194 }
 0x20b   :  { %337 = vrsqrt.f32 %v201_v50  ;;  %v199_v53 = vmul.f32 0.03125, %v195_v52 }
 0x20c   :  { %339 = vrsqrt.f32 %v202_v51 }
 0x20d   :  { %v203_v54 = vadd.f32 1e-05, %v199_v53 }
 0x20f   :  { %341 = vrsqrt.f32 %v203_v54 }
 0x214   :  { %v336_v55 = vpop.eup %335 }
 0x215   :  { %v208_v57 = vmul.f32 %v336_v55, %v176_v29 }
 0x217   :  { %v219_v59 = vmul.f32 %v282_v56, %v208_v57 }
 0x218   :  { %v338_v60 = vpop.eup %337 }
 0x219   :  { %v340_v61 = vpop.eup %339  ;;  %v209_v62 = vmul.f32 %v338_v60, %v177_v35  ;;  %v230_v63 = vadd.f32 %v283_v58, %v219_v59 }
 0x21a   :  { %v210_v0 = vmul.f32 %v340_v61, %v178_v28 }
 0x21b   :  { %v220_v1 = vmul.f32 %v282_v56, %v209_v62  ;;  %v288_v2 = vpack.c.bf16 %v230_v63, %v230_v63 }
 0x21c   :  { %v342_v3 = vpop.eup %341  ;;  %v221_v4 = vmul.f32 %v282_v56, %v210_v0 }
 0x21d   :  { %v211_v5 = vmul.f32 %v342_v3, %v179_v34  ;;  %v231_v6 = vadd.f32 %v283_v58, %v220_v1  ;;  %251 = vst.msk [vmem:[#allocation2] sm:$0xf] %vm250_vm1, %v288_v2 }
 0x21e   :  { %v232_v7 = vadd.f32 %v283_v58, %v221_v4 }
 0x21f   :  { %v222_v8 = vmul.f32 %v282_v56, %v211_v5  ;;  %v289_v9 = vpack.c.bf16 %v231_v6, %v231_v6 }
 0x220   :  { %v290_v10 = vpack.c.bf16 %v232_v7, %v232_v7 }
 0x221   :  { %v233_v11 = vadd.f32 %v283_v58, %v222_v8  ;;  %252 = vst.msk [vmem:[#allocation2 + $0x4] sm:$0xf] %vm250_vm1, %v289_v9 }
 0x222   :  { %253 = vst.msk [vmem:[#allocation2 + $0x8] sm:$0xf] %vm250_vm1, %v290_v10 }
 0x223   :  { %v291_v12 = vpack.c.bf16 %v233_v11, %v233_v11 }
 0x225   :  { %254 = vst.msk [vmem:[#allocation2 + $0xc] sm:$0xf] %vm250_vm1, %v291_v12 }
 0x226   :  { %354 = shalt.err (!%p351_p4)
}
 0x227   :  { %s366_s17 = smov 64   ;;  %s367_s18 = smov 4  }
 0x228   :  { %266 = dma.vmem_to_hbm [thread:$0]  %s261_s4, 256, %s457_s5, [#allocation3], %s366_s17, %s366_s17, %s367_s18  }
 0x229   :  { %363 = dma.done.wait [#allocation3], 256  }
 0x22a   :  { %364 = vsyncadd [#allocation3], 4294967040 }
 0x22b   :  { %270 = vsyncpa [#allocation3], 1 }

</bundles_post_ra>
